<compile_context>
chip_gen: v6e
topology: v6e:2x2x1
jax: 0.10.0
libtpu: 0.0.40
codegen_flags: <defaults>
</compile_context>

<pallas_src>
import functools

import jax
import jax.numpy as jnp
from jax.experimental import pallas as pl
from jax.experimental.pallas import tpu as pltpu

EPSILON = 0.1
IGNORE_INDEX = -100


def _round_up(x, m):
    return (x + m - 1) // m * m


def _label_smoothing_nll_kernel(preds_ref, target_ref,
                                sum_ref, nll_ref, cnt_ref,
                                sum_acc, nll_acc,
                                *, n_rows, n_cols, ignore_index):
    i = pl.program_id(0)                         # row block ("parallel")
    j = pl.program_id(1)                         # class block (reduction, "arbitrary")
    tile_n, tile_c = preds_ref.shape

    preds = preds_ref[...].astype(jnp.float32)   # widen in-kernel, accumulate in f32
    tgt = target_ref[...]                        # (tile_n, 1) i32

    # --- ragged-edge masking (statically gated: interior-divisible shapes pay 0) ---
    ragged_rows = (n_rows % tile_n) != 0
    ragged_cols = (n_cols % tile_c) != 0

    row_ok = None
    if ragged_rows:
        row_ok = (i * tile_n
                  + jax.lax.broadcasted_iota(jnp.int32, (tile_n, 1), 0)) < n_rows
    col_ok = None
    if ragged_cols:
        col_ok = jax.lax.broadcasted_iota(jnp.int32, (1, tile_c), 1) < (n_cols - j * tile_c)

    if row_ok is not None and col_ok is not None:
        preds = jnp.where(row_ok & col_ok, preds, 0.0)
    elif row_ok is not None:
        preds = jnp.where(row_ok, preds, 0.0)
    elif col_ok is not None:
        preds = jnp.where(col_ok, preds, 0.0)

    # --- one-hot gather: grid-invariant lane iota; j-offset lives on the (tile_n,1) target
    lane = jax.lax.broadcasted_iota(jnp.int32, (1, tile_c), 1)
    onehot = lane == (tgt - j * tile_c)                                     # (tile_n, tile_c)
    row_picked = jnp.sum(jnp.where(onehot, preds, 0.0), axis=1, keepdims=True)

    valid = tgt != ignore_index                                             # (tile_n, 1)
    if row_ok is not None:
        valid = jnp.logical_and(valid, row_ok)
    if 0 <= ignore_index < n_cols:
        # Re-mask only needed when ignore_index could collide with a real class column;
        # for negative (default) ignore_index the one-hot can never match it.
        row_picked = jnp.where(valid, row_picked, 0.0)

    tile_sum = jnp.sum(preds, axis=(0, 1), keepdims=True)                   # (1, 1)
    tile_nll = jnp.sum(row_picked, axis=(0, 1), keepdims=True)              # (1, 1)

    @pl.when(j == 0)
    def _():
        sum_acc[...] = jnp.zeros_like(sum_acc)
        nll_acc[...] = jnp.zeros_like(nll_acc)
        # Valid-row count does not depend on j: write once per row block.
        cnt_ref[...] = jnp.sum(valid.astype(jnp.float32),
                               axis=(0, 1), keepdims=True).reshape(1, 1, 1)

    sum_acc[...] += tile_sum
    nll_acc[...] += tile_nll

    @pl.when(j == pl.num_programs(1) - 1)
    def _():
        sum_ref[...] = sum_acc[...].reshape(1, 1, 1)
        nll_ref[...] = nll_acc[...].reshape(1, 1, 1)


def label_smoothing_nll_loss(preds, target, *, epsilon=EPSILON,
                             ignore_index=IGNORE_INDEX,
                             tile_n=None, tile_c=None):
    """preds: (N, C) float log-probs (f32/bf16, native dtype — no wrapper upcast);
    target: (N,) int. Returns scalar f32."""
    N, C = preds.shape
    itemsize = jnp.dtype(preds.dtype).itemsize
    sub = 8 * max(1, 4 // itemsize)          # native sublane pack: 8 f32, 16 bf16, 32 int8

    # Row tile: aim for >= ~4 row blocks so the "parallel" axis feeds both v7x TCs;
    # never larger than the row extent (single full-extent block is always legal).
    if tile_n is None:
        tile_n = 512
    tile_n = min(tile_n, max(sub, _round_up(pl.cdiv(N, 4), sub)))
    tile_n = _round_up(tile_n, 8)
    if tile_n > N:
        tile_n = N

    # Class tile: ~4 MiB of preds per grid step regardless of dtype (amortizes per-step
    # overhead, fits v5e's 16 MiB scoped VMEM double-buffered and v7x's 32 MiB default).
    if tile_c is None:
        tile_c = max(128, (4 * 1024 * 1024) // max(1, tile_n * itemsize))
    tile_c = _round_up(tile_c, 128)
    if tile_c > C:
        tile_c = C                            # single full-extent class block

    grid = (pl.cdiv(N, tile_n), pl.cdiv(C, tile_c))
    num_row_blocks = grid[0]

    tgt2d = target.astype(jnp.int32).reshape(N, 1)

    cost = pl.CostEstimate(
        flops=2 * N * C,
        transcendentals=0,
        bytes_accessed=int(N * C * itemsize + N * 4 + 3 * num_row_blocks * 4),
    )

    kernel = functools.partial(_label_smoothing_nll_kernel,
                               n_rows=N, n_cols=C, ignore_index=ignore_index)

    part_shape = jax.ShapeDtypeStruct((num_row_blocks, 1, 1), jnp.float32)
    part_spec = pl.BlockSpec((1, 1, 1), lambda i, j: (i, 0, 0))

    sums, nlls, cnts = pl.pallas_call(
        kernel,
        out_shape=(part_shape, part_shape, part_shape),
        grid_spec=pltpu.PrefetchScalarGridSpec(
            num_scalar_prefetch=0,
            grid=grid,
            in_specs=[
                pl.BlockSpec((tile_n, tile_c), lambda i, j: (i, j)),
                pl.BlockSpec((tile_n, 1), lambda i, j: (i, 0)),
            ],
            out_specs=[part_spec, part_spec, part_spec],
            scratch_shapes=[pltpu.VMEM((1, 1), jnp.float32),
                            pltpu.VMEM((1, 1), jnp.float32)],
        ),
        compiler_params=pltpu.CompilerParams(
            dimension_semantics=("parallel", "arbitrary"),
        ),
        cost_estimate=cost,
    )(preds, tgt2d)

    # Tiny final combine in JAX (num_row_blocks scalars each).
    total_sum = jnp.sum(sums)
    total_nll = jnp.sum(nlls)
    total_cnt = jnp.sum(cnts)

    loss_mean = -total_sum / jnp.float32(N)      # mean over ALL original rows
    nll_mean = -total_nll / total_cnt            # NaN if no valid rows (matches torch)
    # TODO(synk): out-of-range targets (not ignore_index, not in [0, C)) contribute 0 to
    # the numerator but are counted in the denominator; PyTorch would raise instead.
    return (jnp.float32(epsilon) * (loss_mean / jnp.float32(C))
            + jnp.float32(1.0 - epsilon) * nll_mean)


def _reference(preds, target, epsilon=EPSILON, ignore_index=IGNORE_INDEX):
    # Pure-JAX reference mirroring the PyTorch module.
    N, C = preds.shape
    p = preds.astype(jnp.float32)
    loss = jnp.mean(-jnp.sum(p, axis=-1))
    valid = target != ignore_index
    picked = jnp.take_along_axis(
        p, jnp.clip(target, 0, C - 1)[:, None].astype(jnp.int32), axis=1)[:, 0]
    nll = jnp.sum(jnp.where(valid, -picked, 0.0)) / jnp.sum(valid.astype(jnp.float32))
    return epsilon * (loss / C) + (1.0 - epsilon) * nll


if __name__ == "__main__":
    key = jax.random.PRNGKey(0)
    k1, k2, k3, k4, k5, k6 = jax.random.split(key, 6)

    # Test 1: small shape, single (full-extent) block; f32 and bf16 input paths.
    N, C = 8, 32
    logits = jax.random.normal(k1, (N, C), dtype=jnp.float32)
    preds = jax.nn.log_softmax(logits, axis=-1)             # log-probs, as NLL expects
    target = jax.random.randint(k2, (N,), 0, C, dtype=jnp.int32)
    target = target.at[0].set(IGNORE_INDEX)                 # exercise ignore_index path
    out = label_smoothing_nll_loss(preds, target)
    jax.block_until_ready(out)
    ref = _reference(preds, target)
    assert jnp.allclose(out, ref, atol=1e-5, rtol=1e-5), (out, ref)

    preds_bf16 = preds.astype(jnp.bfloat16)
    out_bf16 = label_smoothing_nll_loss(preds_bf16, target)
    jax.block_until_ready(out_bf16)
    ref_bf16 = _reference(preds_bf16, target)
    assert jnp.allclose(out_bf16, ref_bf16, atol=1e-3, rtol=1e-3), (out_bf16, ref_bf16)

    # Test 2: explicit small tiles -> 3x3 grid with ragged edge tiles on BOTH axes
    # (no wrapper padding); exercises in-kernel edge masking, cross-class-block
    # accumulation, and the 'parallel' row axis.
    N2, C2 = 20, 300
    logits2 = jax.random.normal(k3, (N2, C2), dtype=jnp.float32)
    preds2 = jax.nn.log_softmax(logits2, axis=-1)
    target2 = jax.random.randint(k4, (N2,), 0, C2, dtype=jnp.int32)
    target2 = target2.at[3].set(IGNORE_INDEX)
    out2 = label_smoothing_nll_loss(preds2, target2, tile_n=8, tile_c=128)
    jax.block_until_ready(out2)
    ref2 = _reference(preds2, target2)
    assert jnp.allclose(out2, ref2, atol=1e-5, rtol=1e-5), (out2, ref2)

    # Test 3: default tile selection (row clamp for >= 4 row blocks, full-extent
    # class block) with a ragged last row block.
    N3, C3 = 100, 500
    logits3 = jax.random.normal(k5, (N3, C3), dtype=jnp.float32)
    preds3 = jax.nn.log_softmax(logits3, axis=-1)
    target3 = jax.random.randint(k6, (N3,), 0, C3, dtype=jnp.int32)
    target3 = target3.at[7].set(IGNORE_INDEX)
    out3 = label_smoothing_nll_loss(preds3, target3)
    jax.block_until_ready(out3)
    ref3 = _reference(preds3, target3)
    assert jnp.allclose(out3, ref3, atol=1e-5, rtol=1e-5), (out3, ref3)

    print("KERNEL_OK")
</pallas_src>

<mosaic_0001>
module attributes {stable_mosaic.version = 11 : i64} {
  func.func @_label_smoothing_nll_kernel(%arg0: i32, %arg1: i32, %arg2: memref<8x32xf32, #tpu.memory_space<vmem>>, %arg3: memref<8x1xi32, #tpu.memory_space<vmem>>, %arg4: memref<1x1x1xf32, #tpu.memory_space<vmem>>, %arg5: memref<1x1x1xf32, #tpu.memory_space<vmem>>, %arg6: memref<1x1x1xf32, #tpu.memory_space<vmem>>, %arg7: memref<1x1xf32, #tpu.memory_space<vmem>>, %arg8: memref<1x1xf32, #tpu.memory_space<vmem>>) attributes {dimension_semantics = [#tpu.dimension_semantics<parallel>, #tpu.dimension_semantics<arbitrary>], iteration_bounds = array<i64: 1, 1>, scalar_prefetch = 0 : i64, scratch_operands = 2 : i64, tpu.core_type = #tpu.core_type<tc>, window_params = [{transform_indices = @transform_0, window_bounds = array<i64: 8, 32>}, {transform_indices = @transform_1, window_bounds = array<i64: 8, 1>}, {transform_indices = @transform_2, window_bounds = array<i64: 1, 1, 1>}, {transform_indices = @transform_3, window_bounds = array<i64: 1, 1, 1>}, {transform_indices = @transform_4, window_bounds = array<i64: 1, 1, 1>}]} {
    %c0 = arith.constant 0 : index
    %c0_0 = arith.constant 0 : index
    %0 = vector.load %arg2[%c0, %c0_0] : memref<8x32xf32, #tpu.memory_space<vmem>>, vector<8x32xf32>
    %c0_1 = arith.constant 0 : index
    %c0_2 = arith.constant 0 : index
    %1 = vector.load %arg3[%c0_1, %c0_2] : memref<8x1xi32, #tpu.memory_space<vmem>>, vector<8x1xi32>
    %2 = tpu.iota {dimensions = array<i32: 1>} : vector<1x32xi32>
    %c32_i32 = arith.constant 32 : i32
    %3 = arith.muli %arg1, %c32_i32 : i32
    %4 = vector.broadcast %3 : i32 to vector<8x1xi32>
    %5 = arith.subi %1, %4 : vector<8x1xi32>
    %6 = vector.broadcast %2 : vector<1x32xi32> to vector<8x32xi32>
    %7 = vector.broadcast %5 : vector<8x1xi32> to vector<8x32xi32>
    %8 = arith.cmpi eq, %6, %7 : vector<8x32xi32>
    %cst = arith.constant 0.000000e+00 : f32
    %9 = vector.broadcast %cst : f32 to vector<8x32xf32>
    %10 = arith.select %8, %0, %9 : vector<8x32xi1>, vector<8x32xf32>
    %cst_3 = arith.constant dense<0.000000e+00> : vector<8xf32>
    %11 = vector.multi_reduction <add>, %10, %cst_3 [1] : vector<8x32xf32> to vector<8xf32>
    %12 = vector.shape_cast %11 : vector<8xf32> to vector<8x1xf32>
    %c-100_i32 = arith.constant -100 : i32
    %13 = vector.broadcast %c-100_i32 : i32 to vector<8x1xi32>
    %14 = arith.cmpi ne, %1, %13 : vector<8x1xi32>
    %15 = vector.shape_cast %0 : vector<8x32xf32> to vector<1x8x32xf32>
    %cst_4 = arith.constant dense<0.000000e+00> : vector<1xf32>
    %16 = vector.multi_reduction <add>, %15, %cst_4 [1, 2] : vector<1x8x32xf32> to vector<1xf32>
    %17 = vector.shape_cast %16 : vector<1xf32> to vector<1x1x1xf32>
    %18 = vector.extract %17[0, 0, 0] : f32 from vector<1x1x1xf32>
    %19 = vector.broadcast %18 : f32 to vector<1x1xf32>
    %20 = vector.shape_cast %12 : vector<8x1xf32> to vector<1x8x1xf32>
    %cst_5 = arith.constant dense<0.000000e+00> : vector<1xf32>
    %21 = vector.multi_reduction <add>, %20, %cst_5 [1, 2] : vector<1x8x1xf32> to vector<1xf32>
    %22 = vector.shape_cast %21 : vector<1xf32> to vector<1x1x1xf32>
    %23 = vector.extract %22[0, 0, 0] : f32 from vector<1x1x1xf32>
    %24 = vector.broadcast %23 : f32 to vector<1x1xf32>
    %c0_i32 = arith.constant 0 : i32
    %25 = arith.cmpi eq, %arg1, %c0_i32 : i32
    %26 = arith.extui %25 : i1 to i32
    %c0_i32_6 = arith.constant 0 : i32
    %27 = arith.cmpi ne, %26, %c0_i32_6 : i32
    scf.if %27 {
      %cst_17 = arith.constant 0.000000e+00 : f32
      %37 = vector.broadcast %cst_17 : f32 to vector<1x1xf32>
      %c0_18 = arith.constant 0 : index
      %c0_19 = arith.constant 0 : index
      %38 = vector.load %arg7[%c0_18, %c0_19] : memref<1x1xf32, #tpu.memory_space<vmem>>, vector<1x1xf32>
      tpu.vector_store %arg7[%c0_18, %c0_19], %37 {strides = array<i32>} : memref<1x1xf32, #tpu.memory_space<vmem>>, vector<1x1xf32>,
      %cst_20 = arith.constant 0.000000e+00 : f32
      %39 = vector.broadcast %cst_20 : f32 to vector<1x1xf32>
      %c0_21 = arith.constant 0 : index
      %c0_22 = arith.constant 0 : index
      %40 = vector.load %arg8[%c0_21, %c0_22] : memref<1x1xf32, #tpu.memory_space<vmem>>, vector<1x1xf32>
      tpu.vector_store %arg8[%c0_21, %c0_22], %39 {strides = array<i32>} : memref<1x1xf32, #tpu.memory_space<vmem>>, vector<1x1xf32>,
      %41 = arith.extui %14 : vector<8x1xi1> to vector<8x1xi32>
      %42 = arith.sitofp %41 : vector<8x1xi32> to vector<8x1xf32>
      %43 = vector.shape_cast %42 : vector<8x1xf32> to vector<1x8x1xf32>
      %cst_23 = arith.constant dense<0.000000e+00> : vector<1xf32>
      %44 = vector.multi_reduction <add>, %43, %cst_23 [1, 2] : vector<1x8x1xf32> to vector<1xf32>
      %45 = vector.shape_cast %44 : vector<1xf32> to vector<1x1x1xf32>
      %46 = vector.extract %45[0, 0, 0] : f32 from vector<1x1x1xf32>
      %47 = vector.broadcast %46 : f32 to vector<1x1xf32>
      %48 = vector.shape_cast %47 : vector<1x1xf32> to vector<1x1x1xf32>
      %c0_24 = arith.constant 0 : index
      %c0_25 = arith.constant 0 : index
      %c0_26 = arith.constant 0 : index
      %49 = vector.load %arg6[%c0_24, %c0_25, %c0_26] : memref<1x1x1xf32, #tpu.memory_space<vmem>>, vector<1x1x1xf32>
      tpu.vector_store %arg6[%c0_24, %c0_25, %c0_26], %48 {strides = array<i32>} : memref<1x1x1xf32, #tpu.memory_space<vmem>>, vector<1x1x1xf32>,
    } else {
    }
    %c0_7 = arith.constant 0 : index
    %c0_8 = arith.constant 0 : index
    %28 = vector.load %arg7[%c0_7, %c0_8] : memref<1x1xf32, #tpu.memory_space<vmem>>, vector<1x1xf32>
    %29 = arith.addf %28, %19 : vector<1x1xf32>
    %c0_9 = arith.constant 0 : index
    %c0_10 = arith.constant 0 : index
    %30 = vector.load %arg7[%c0_9, %c0_10] : memref<1x1xf32, #tpu.memory_space<vmem>>, vector<1x1xf32>
    tpu.vector_store %arg7[%c0_9, %c0_10], %29 {strides = array<i32>} : memref<1x1xf32, #tpu.memory_space<vmem>>, vector<1x1xf32>,
    %c0_11 = arith.constant 0 : index
    %c0_12 = arith.constant 0 : index
    %31 = vector.load %arg8[%c0_11, %c0_12] : memref<1x1xf32, #tpu.memory_space<vmem>>, vector<1x1xf32>
    %32 = arith.addf %31, %24 : vector<1x1xf32>
    %c0_13 = arith.constant 0 : index
    %c0_14 = arith.constant 0 : index
    %33 = vector.load %arg8[%c0_13, %c0_14] : memref<1x1xf32, #tpu.memory_space<vmem>>, vector<1x1xf32>
    tpu.vector_store %arg8[%c0_13, %c0_14], %32 {strides = array<i32>} : memref<1x1xf32, #tpu.memory_space<vmem>>, vector<1x1xf32>,
    %c0_i32_15 = arith.constant 0 : i32
    %34 = arith.cmpi eq, %arg1, %c0_i32_15 : i32
    %35 = arith.extui %34 : i1 to i32
    %c0_i32_16 = arith.constant 0 : i32
    %36 = arith.cmpi ne, %35, %c0_i32_16 : i32
    scf.if %36 {
      %c0_17 = arith.constant 0 : index
      %c0_18 = arith.constant 0 : index
      %37 = vector.load %arg7[%c0_17, %c0_18] : memref<1x1xf32, #tpu.memory_space<vmem>>, vector<1x1xf32>
      %38 = vector.shape_cast %37 : vector<1x1xf32> to vector<1x1x1xf32>
      %c0_19 = arith.constant 0 : index
      %c0_20 = arith.constant 0 : index
      %c0_21 = arith.constant 0 : index
      %39 = vector.load %arg4[%c0_19, %c0_20, %c0_21] : memref<1x1x1xf32, #tpu.memory_space<vmem>>, vector<1x1x1xf32>
      tpu.vector_store %arg4[%c0_19, %c0_20, %c0_21], %38 {strides = array<i32>} : memref<1x1x1xf32, #tpu.memory_space<vmem>>, vector<1x1x1xf32>,
      %c0_22 = arith.constant 0 : index
      %c0_23 = arith.constant 0 : index
      %40 = vector.load %arg8[%c0_22, %c0_23] : memref<1x1xf32, #tpu.memory_space<vmem>>, vector<1x1xf32>
      %41 = vector.shape_cast %40 : vector<1x1xf32> to vector<1x1x1xf32>
      %c0_24 = arith.constant 0 : index
      %c0_25 = arith.constant 0 : index
      %c0_26 = arith.constant 0 : index
      %42 = vector.load %arg5[%c0_24, %c0_25, %c0_26] : memref<1x1x1xf32, #tpu.memory_space<vmem>>, vector<1x1x1xf32>
      tpu.vector_store %arg5[%c0_24, %c0_25, %c0_26], %41 {strides = array<i32>} : memref<1x1x1xf32, #tpu.memory_space<vmem>>, vector<1x1x1xf32>,
    } else {
    }
    return
  }
  func.func @transform_0(%arg0: i32, %arg1: i32) -> (i32, i32) {
    %c0_i32 = arith.constant 0 : i32
    return %arg0, %arg1 : i32, i32
  }
  func.func @transform_1(%arg0: i32, %arg1: i32) -> (i32, i32) {
    %c0_i32 = arith.constant 0 : i32
    %c0_i32_0 = arith.constant 0 : i32
    return %arg0, %c0_i32 : i32, i32
  }
  func.func @transform_2(%arg0: i32, %arg1: i32) -> (i32, i32, i32) {
    %c0_i32 = arith.constant 0 : i32
    %c0_i32_0 = arith.constant 0 : i32
    %c0_i32_1 = arith.constant 0 : i32
    return %arg0, %c0_i32, %c0_i32_0 : i32, i32, i32
  }
  func.func @transform_3(%arg0: i32, %arg1: i32) -> (i32, i32, i32) {
    %c0_i32 = arith.constant 0 : i32
    %c0_i32_0 = arith.constant 0 : i32
    %c0_i32_1 = arith.constant 0 : i32
    return %arg0, %c0_i32, %c0_i32_0 : i32, i32, i32
  }
  func.func @transform_4(%arg0: i32, %arg1: i32) -> (i32, i32, i32) {
    %c0_i32 = arith.constant 0 : i32
    %c0_i32_0 = arith.constant 0 : i32
    %c0_i32_1 = arith.constant 0 : i32
    return %arg0, %c0_i32, %c0_i32_0 : i32, i32, i32
  }
}

</mosaic_0001>

<bundles_post_ra>
// kernel: tpu_custom_call.1
= control target key start
LH: loop header
LB: loop body
LE: loop exit
PB: predicated region body
PF: predicated region fallthrough
CT: control target
= control target key end

     0   :  { %10 = vsyncpa [#allocation5], 0  ;;  %vm28_vm0 = vcmask 261120   ;;  %s261_s0 = inlined_call_operand.vmem [shape: f32[8,32], index: 0, kind: input, shape index: {}]   ;;  %s262_s1 = inlined_call_operand.vmem [shape: s32[8,1], index: 1, kind: input, shape index: {}]   ;;  %s263_s2 = inlined_call_operand.hbm [shape: f32[1,1,1], index: 2, kind: output, shape index: {0}]   ;;  %s264_s3 = inlined_call_operand.hbm [shape: f32[1,1,1], index: 3, kind: output, shape index: {1}]   ;;  %s265_s4 = inlined_call_operand.hbm [shape: f32[1,1,1], index: 4, kind: output, shape index: {2}]  }
   0x1   :  { %v17_v0 = vld [vmem:[%s262_s1] sm:$0xff] }
   0x2   :  { %v16_v1 = vld [vmem:[%s261_s0] sm:$0xff] }
   0x3   :  { %11 = vsyncpa [#allocation7], 0  ;;  %v209_v2 = vmov 0   ;;  %v33_v3 = vsel %vm28_vm0, %v16_v1, 0.0  ;;  %v18_v4 = vlaneseq  ;;  %vm32_vm2 = vcmp.ne.s32.totalorder %v17_v0, 4294967196  ;;  %s211_s1 = smov [#allocation4]  }
   0x4   :  { %144 = vset.pattern.permute.xlu0 %v209_v2  ;;  %34 = vadd.xlane.f32.xlu1 %v33_v3  ;;  %vm60_vm3 = vcmask 0   ;;  %v210_v9 = vmov 0.0   ;;  %vm44_vm4 = vcmask 7168   ;;  %s97_s19 = sshll.u32 %s211_s1, 4  ;;  %s98_s19 = int_to_ptr.vmem [resolvable:$true] %s97_s19 }
   0x5   :  { %24 = vperm.xlu0 %144, %v17_v0   ;;  %v19_v5 = vand.u32 127, %v18_v4  ;;  %61 = vst.msk [vmem:[#allocation2] sm:$0x1] %vm60_vm3, %v210_v9  ;;  %62 = vst.msk [vmem:[#allocation3] sm:$0x1] %vm60_vm3, %v210_v9  ;;  %v132_v10 = vsel %vm32_vm2, 1.0, %v210_v9  ;;  %p150_p1 = scmp.lt.s32.totalorder %s98_s19, %s98_s19 }
   0x6   :  { %v65_v16 = vsel %vm44_vm4, %v132_v10, 0.0  ;;  %s145_s20 = scalar_lea.vmem %s98_s19, 16  ;;  %s149_s21 = scalar_lea.vmem %s98_s19, 32 }
   0x7   :  { %p146_p0 = scmp.ne.s32.totalorder %s98_s19, %s145_s20  ;;  %p151_p2 = scmp.lt.s32.totalorder %s149_s21, %s145_s20 }
   0x9   :  { %p152_p3 = por %p151_p2, %p150_p1 }
   0xb   :  { %p153_p4 = pnand %p152_p3, %p146_p0 }
   0xc   :  { %v77_v21 = vld [vmem:[#allocation2] sm:$0x1] }
  0x80   :  { %v25_v6 = vpop.permute.xlu0 %24 }
  0x81   :  { %vm26_vm1 = vcmp.eq.s32.totalorder %v19_v5, %v25_v6 }
  0x82   :  { %v27_v7 = vsel %vm26_vm1, %v16_v1, 0.0 }
  0x83   :  { %v29_v8 = vsel %vm28_vm0, %v27_v7, 0.0 }
  0x84   :  { %30 = vadd.xlane.f32.xlu0 %v29_v8 }
  0x8d   :  { %v35_v11 = vpop.xlane.xlu1 %34 }
  0x8e   :  { %v36_v12 = vrot.slane %v35_v11, 4 }
  0x90   :  { %v37_v14 = vadd.f32 %v36_v12, %v35_v11 }
  0x92   :  { %v38_v17 = vrot.slane %v37_v14, 2 }
  0x94   :  { %v39_v18 = vadd.f32 %v38_v17, %v37_v14 }
  0x96   :  { %v40_v19 = vrot.slane %v39_v18, 1 }
  0x98   :  { %v41_v20 = vadd.f32 %v40_v19, %v39_v18 }
  0x9a   :  { %133 = vpush %v41_v20 }
  0xcb   :  { %s134_s0 = spop %133 }
  0xcc   :  { %v43_v22 = vstv %s134_s0 }
  0xcd   :  { %v78_v23 = vadd.f32 %v77_v21, %v43_v22 }
  0xcf   :  { %80 = vst.msk [vmem:[#allocation2] sm:$0x1] %vm60_vm3, %v78_v23 }
  0xd6   :  { %v87_v24 = vld [vmem:[#allocation2] sm:$0x1] }
  0xd7   :  { %88 = vst.msk [vmem:[#allocation4] sm:$0x1] %vm60_vm3, %v87_v24 }
 0x10d   :  { %v31_v13 = vpop.xlane.xlu0 %30 }
 0x10e   :  { %v45_v15 = vsel %vm44_vm4, %v31_v13, 0.0 }
 0x10f   :  { %46 = vadd.xlane.f32.xlu1 %v45_v15 }
 0x113   :  { %66 = vadd.xlane.f32.xlu1 %v65_v16 }
 0x114   :  { %156 = shalt.err (!%p153_p4)
}
 0x115   :  { %100 = dma.vmem_to_hbm [thread:$0]  %s98_s19, 16, %s263_s2, [#allocation5]   ;;  %v81_v39 = vld [vmem:[#allocation3] sm:$0x1] }
 0x116   :  { %s212_s25 = smov [#allocation6]   ;;  %s213_s27 = smov [#allocation8]  }
 0x117   :  { %s107_s26 = sshll.u32 %s212_s25, 4  ;;  %s117_s28 = sshll.u32 %s213_s27, 4  ;;  %s108_s26 = int_to_ptr.vmem [resolvable:$true] %s107_s26  ;;  %s118_s28 = int_to_ptr.vmem [resolvable:$true] %s117_s28 }
 0x118   :  { %s165_s29 = scalar_lea.vmem %s108_s26, 16  ;;  %s169_s30 = scalar_lea.vmem %s108_s26, 32 }
 0x119   :  { %p166_p5 = scmp.ne.s32.totalorder %s108_s26, %s165_s29  ;;  %p170_p6 = scmp.lt.s32.totalorder %s108_s26, %s108_s26 }
 0x11a   :  { %p171_p7 = scmp.lt.s32.totalorder %s169_s30, %s165_s29 }
 0x11c   :  { %p172_p8 = por %p171_p7, %p170_p6 }
 0x11e   :  { %p173_p9 = pnand %p172_p8, %p166_p5 }
 0x198   :  { %v47_v25 = vpop.xlane.xlu1 %46 }
 0x199   :  { %v48_v26 = vrot.slane %v47_v25, 4 }
 0x19b   :  { %v49_v27 = vadd.f32 %v48_v26, %v47_v25 }
 0x19c   :  { %v67_v28 = vpop.xlane.xlu1 %66 }
 0x19d   :  { %v50_v29 = vrot.slane %v49_v27, 2  ;;  %v68_v30 = vrot.slane %v67_v28, 4 }
 0x19f   :  { %v69_v31 = vadd.f32 %v68_v30, %v67_v28  ;;  %v51_v32 = vadd.f32 %v50_v29, %v49_v27 }
 0x1a1   :  { %v70_v33 = vrot.slane %v69_v31, 2  ;;  %v52_v34 = vrot.slane %v51_v32, 1 }
 0x1a3   :  { %v71_v35 = vadd.f32 %v70_v33, %v69_v31  ;;  %v53_v36 = vadd.f32 %v52_v34, %v51_v32 }
 0x1a5   :  { %135 = vpush %v53_v36  ;;  %v72_v37 = vrot.slane %v71_v35, 1 }
 0x1a7   :  { %v73_v38 = vadd.f32 %v72_v37, %v71_v35 }
 0x1a9   :  { %137 = vpush %v73_v38 }
 0x1d6   :  { %s136_s24 = spop %135 }
 0x1d7   :  { %v55_v40 = vstv %s136_s24 }
 0x1d8   :  { %v82_v41 = vadd.f32 %v81_v39, %v55_v40 }
 0x1da   :  { %83 = vst.msk [vmem:[#allocation3] sm:$0x1] %vm60_vm3, %v82_v41  ;;  %s138_s2 = spop %137 }
 0x1db   :  { %v75_v42 = vstv %s138_s2 }
 0x1dc   :  { %76 = vst.msk [vmem:[#allocation8] sm:$0x1] %vm60_vm3, %v75_v42 }
 0x1e1   :  { %v89_v43 = vld [vmem:[#allocation3] sm:$0x1] }
 0x1e2   :  { %90 = vst.msk [vmem:[#allocation6] sm:$0x1] %vm60_vm3, %v89_v43 }
 0x1e3   :  { %176 = shalt.err (!%p173_p9)
}
 0x1e4   :  { %110 = dma.vmem_to_hbm [thread:$0]  %s108_s26, 16, %s264_s3, [#allocation7]  }
 0x1e5   :  { %s185_s7 = scalar_lea.vmem %s118_s28, 16  ;;  %s189_s8 = scalar_lea.vmem %s118_s28, 32 }
 0x1e6   :  { %p186_p10 = scmp.ne.s32.totalorder %s118_s28, %s185_s7  ;;  %p190_p11 = scmp.lt.s32.totalorder %s118_s28, %s118_s28 }
 0x1e7   :  { %p191_p12 = scmp.lt.s32.totalorder %s189_s8, %s185_s7 }
 0x1e9   :  { %p192_p13 = por %p191_p12, %p190_p11 }
 0x1eb   :  { %p193_p0 = pnand %p192_p13, %p186_p10 }
 0x1ed   :  { %196 = shalt.err (!%p193_p0)
}
 0x1ee   :  { %120 = dma.vmem_to_hbm [thread:$0]  %s118_s28, 16, %s265_s4, [#allocation7]  }
 0x1ef   :  { %205 = dma.done.wait [#allocation5], 16  }
 0x1f0   :  { %206 = vsyncadd [#allocation5], 4294967280 }
 0x1f1   :  { %207 = dma.done.wait [#allocation7], 32  }
 0x1f2   :  { %208 = vsyncadd [#allocation7], 4294967264 }
 0x1f3   :  { %130 = vsyncpa [#allocation5], 1 }
 0x1f4   :  { %131 = vsyncpa [#allocation7], 1 }

</bundles_post_ra>
